<compile_context>
chip_gen: v5e
topology: v5e:2x2
jax: 0.10.0
libtpu: 0.0.40
codegen_flags: <defaults>
</compile_context>

<pallas_src>
import functools

import jax
import jax.numpy as jnp
from jax.experimental import pallas as pl
from jax.experimental.pallas import tpu as pltpu

_OUT_W = 128  # lane-dense combined-output width: [enc | dec | pad]


def _autoencoder_kernel(x_ref,
                        w1_ref, b1_ref,
                        w23_ref, b23_ref,
                        wenc_ref, wdec_ref, bout_ref,
                        out_ref):
    """Fused encoder+decoder for one batch tile; everything VMEM-resident."""
    x = x_ref[...]

    # h1 = ReLU(x @ w1 + b1)                                  (TB, 64)
    h1 = jnp.dot(x, w1_ref[...], preferred_element_type=jnp.float32) + b1_ref[...]
    h1 = jnp.maximum(h1, 0.0)
    h1c = h1.astype(w23_ref.dtype)

    # h2 = ReLU(h1 @ (w2@w3) + (b2@w3 + b3))  == ReLU(enc @ w3 + b3)   (TB, 64)
    h2 = jnp.dot(h1c, w23_ref[...], preferred_element_type=jnp.float32) + b23_ref[...]
    h2 = jnp.maximum(h2, 0.0)
    h2c = h2.astype(wdec_ref.dtype)

    # Lane-dense combined output: lanes [0:32) = enc = h1 @ w2 + b2,
    # lanes [32:56) = dec = h2 @ w4 + b4, rest zero.  Single full-width store.
    out = (jnp.dot(h1c, wenc_ref[...], preferred_element_type=jnp.float32)
           + jnp.dot(h2c, wdec_ref[...], preferred_element_type=jnp.float32)
           + bout_ref[...])
    out_ref[...] = out.astype(out_ref.dtype)


def _round_up(a, m):
    return (a + m - 1) // m * m


@functools.partial(jax.jit, static_argnames=("block_batch", "compute_dtype"))
def bottom_model_forward(x, params, *, block_batch=1024, compute_dtype=jnp.float32):
    """Pallas forward. Returns (encoded, decoded) matching the PyTorch module."""
    w1, b1, w2, b2, w3, b3, w4, b4 = params
    B, input_dim = x.shape
    hidden_dim = w1.shape[1]
    output_dim = w2.shape[1]

    # ---- algebraic fusion (f32): fold decoder layer-0 through the (linear)
    # encoder output:  enc @ w3 + b3 == h1 @ (w2 @ w3) + (b2 @ w3 + b3)
    w23 = w2 @ w3
    b23 = b2 @ w3 + b3

    # ---- lane-dense padded output weights: out = [enc | dec | 0]  (width 128)
    wenc = jnp.zeros((hidden_dim, _OUT_W), jnp.float32).at[:, :output_dim].set(w2)
    wdec = (jnp.zeros((hidden_dim, _OUT_W), jnp.float32)
            .at[:, output_dim:output_dim + input_dim].set(w4))
    bout = (jnp.zeros((1, _OUT_W), jnp.float32)
            .at[:, :output_dim].set(b2[0])
            .at[:, output_dim:output_dim + input_dim].set(b4[0]))

    # ---- operand dtype for the MXU (bf16 recommended on v6e/v7x for big B)
    xc = x.astype(compute_dtype)
    w1c = w1.astype(compute_dtype)
    w23c = w23.astype(compute_dtype)
    wencc = wenc.astype(compute_dtype)
    wdecc = wdec.astype(compute_dtype)

    # ---- batch tiling (TB multiple of 8; pad B up to a multiple of TB)
    tb = _round_up(min(block_batch, _round_up(B, 8)), 8)
    B_pad = _round_up(B, tb)
    if B_pad != B:
        xc = jnp.pad(xc, ((0, B_pad - B), (0, 0)))
    grid = (B_pad // tb,)

    def resident(arr):
        nd = arr.ndim
        return pl.BlockSpec(arr.shape, lambda i: (0,) * nd)

    in_specs = [
        pl.BlockSpec((tb, input_dim), lambda i: (i, 0)),   # x: tiled over batch
        resident(w1c), resident(b1),                       # weights: VMEM-resident
        resident(w23c), resident(b23),
        resident(wencc), resident(wdecc), resident(bout),
    ]
    out_specs = pl.BlockSpec((tb, _OUT_W), lambda i: (i, 0))

    out = pl.pallas_call(
        _autoencoder_kernel,
        out_shape=jax.ShapeDtypeStruct((B_pad, _OUT_W), jnp.float32),
        grid=grid,
        in_specs=in_specs,
        out_specs=out_specs,
        compiler_params=pltpu.CompilerParams(
            dimension_semantics=("parallel",)),   # megacore-shardable batch axis
    )(xc, w1c, b1, w23c, b23, wencc, wdecc, bout)

    encoded = out[:B, :output_dim]
    decoded = out[:B, output_dim:output_dim + input_dim]
    return encoded, decoded


def init_params(key, input_dim=24, hidden_dim=64, output_dim=32):
    """PyTorch-Linear-style init: U(-1/sqrt(fan_in), 1/sqrt(fan_in)).

    Weights stored as (in, out); biases as (1, out) to broadcast on the lane axis.
    """
    def linear(key, fan_in, fan_out):
        kw, kb = jax.random.split(key)
        bound = 1.0 / jnp.sqrt(fan_in)
        w = jax.random.uniform(kw, (fan_in, fan_out), jnp.float32, -bound, bound)
        b = jax.random.uniform(kb, (1, fan_out), jnp.float32, -bound, bound)
        return w, b

    k1, k2, k3, k4 = jax.random.split(key, 4)
    w1, b1 = linear(k1, input_dim, hidden_dim)   # encoder.0
    w2, b2 = linear(k2, hidden_dim, output_dim)  # encoder.2
    w3, b3 = linear(k3, output_dim, hidden_dim)  # decoder.0
    w4, b4 = linear(k4, hidden_dim, input_dim)   # decoder.2
    return (w1, b1, w2, b2, w3, b3, w4, b4)


def reference_forward(x, params):
    """Pure-JAX reference of the un-fused PyTorch forward."""
    w1, b1, w2, b2, w3, b3, w4, b4 = params
    h1 = jnp.maximum(x @ w1 + b1, 0.0)
    enc = h1 @ w2 + b2
    h2 = jnp.maximum(enc @ w3 + b3, 0.0)
    dec = h2 @ w4 + b4
    return enc, dec


if __name__ == "__main__":
    key = jax.random.PRNGKey(0)
    k_params, k_x, k_x2 = jax.random.split(key, 3)

    input_dim, hidden_dim, output_dim = 24, 64, 32
    batch = 8

    params = init_params(k_params, input_dim, hidden_dim, output_dim)
    x = jax.random.normal(k_x, (batch, input_dim), dtype=jnp.float32)

    encoded, decoded = bottom_model_forward(x, params)
    jax.block_until_ready((encoded, decoded))

    enc_ref, dec_ref = reference_forward(x, params)
    assert encoded.shape == (batch, output_dim)
    assert decoded.shape == (batch, input_dim)
    # dec tolerance accounts for the (numerically equivalent) W2@W3 pre-fusion.
    assert jnp.allclose(encoded, enc_ref, atol=1e-4, rtol=1e-4)
    assert jnp.allclose(decoded, dec_ref, atol=1e-4, rtol=1e-4)

    # Exercise the batch grid + padding path: non-multiple batch, multi-tile grid.
    x2 = jax.random.normal(k_x2, (100, input_dim), dtype=jnp.float32)
    enc2, dec2 = bottom_model_forward(x2, params, block_batch=32)
    jax.block_until_ready((enc2, dec2))
    enc2_ref, dec2_ref = reference_forward(x2, params)
    assert enc2.shape == (100, output_dim) and dec2.shape == (100, input_dim)
    assert jnp.allclose(enc2, enc2_ref, atol=1e-4, rtol=1e-4)
    assert jnp.allclose(dec2, dec2_ref, atol=1e-4, rtol=1e-4)

    # TODO(synk): for large-batch deployment on v6e/v7x, pass
    # compute_dtype=jnp.bfloat16 (and loosen test tolerance to ~1e-2).
    print("KERNEL_OK")
</pallas_src>

<mosaic_0001>
module attributes {stable_mosaic.version = 11 : i64} {
  func.func @_autoencoder_kernel(%arg0: i32, %arg1: memref<8x24xf32, #tpu.memory_space<vmem>>, %arg2: memref<24x64xf32, #tpu.memory_space<vmem>>, %arg3: memref<1x64xf32, #tpu.memory_space<vmem>>, %arg4: memref<64x64xf32, #tpu.memory_space<vmem>>, %arg5: memref<1x64xf32, #tpu.memory_space<vmem>>, %arg6: memref<64x128xf32, #tpu.memory_space<vmem>>, %arg7: memref<64x128xf32, #tpu.memory_space<vmem>>, %arg8: memref<1x128xf32, #tpu.memory_space<vmem>>, %arg9: memref<8x128xf32, #tpu.memory_space<vmem>>) attributes {dimension_semantics = [#tpu.dimension_semantics<parallel>], iteration_bounds = array<i64: 1>, scalar_prefetch = 0 : i64, scratch_operands = 0 : i64, tpu.core_type = #tpu.core_type<tc>, window_params = [{transform_indices = @transform_0, window_bounds = array<i64: 8, 24>}, {pipeline_mode = #tpu.pipeline_mode<synchronous>, transform_indices = @transform_1, window_bounds = array<i64: 24, 64>}, {pipeline_mode = #tpu.pipeline_mode<synchronous>, transform_indices = @transform_2, window_bounds = array<i64: 1, 64>}, {pipeline_mode = #tpu.pipeline_mode<synchronous>, transform_indices = @transform_3, window_bounds = array<i64: 64, 64>}, {pipeline_mode = #tpu.pipeline_mode<synchronous>, transform_indices = @transform_4, window_bounds = array<i64: 1, 64>}, {pipeline_mode = #tpu.pipeline_mode<synchronous>, transform_indices = @transform_5, window_bounds = array<i64: 64, 128>}, {pipeline_mode = #tpu.pipeline_mode<synchronous>, transform_indices = @transform_6, window_bounds = array<i64: 64, 128>}, {pipeline_mode = #tpu.pipeline_mode<synchronous>, transform_indices = @transform_7, window_bounds = array<i64: 1, 128>}, {transform_indices = @transform_8, window_bounds = array<i64: 8, 128>}]} {
    %c0 = arith.constant 0 : index
    %c0_0 = arith.constant 0 : index
    %0 = vector.load %arg1[%c0, %c0_0] : memref<8x24xf32, #tpu.memory_space<vmem>>, vector<8x24xf32>
    %c0_1 = arith.constant 0 : index
    %c0_2 = arith.constant 0 : index
    %1 = vector.load %arg2[%c0_1, %c0_2] : memref<24x64xf32, #tpu.memory_space<vmem>>, vector<24x64xf32>
    %cst = arith.constant dense<0.000000e+00> : vector<8x64xf32>
    %2 = tpu.matmul %0, %1, %cst {dimension_numbers = #tpu.dot_dimension_numbers<[1], [0], [0], [1], [0, 0, 1, 1], [], []>} : vector<8x24xf32>, vector<24x64xf32>, vector<8x64xf32> -> vector<8x64xf32>
    %c0_3 = arith.constant 0 : index
    %c0_4 = arith.constant 0 : index
    %3 = vector.load %arg3[%c0_3, %c0_4] : memref<1x64xf32, #tpu.memory_space<vmem>>, vector<1x64xf32>
    %4 = vector.broadcast %3 : vector<1x64xf32> to vector<8x64xf32>
    %5 = arith.addf %2, %4 : vector<8x64xf32>
    %cst_5 = arith.constant 0.000000e+00 : f32
    %6 = vector.broadcast %cst_5 : f32 to vector<8x64xf32>
    %7 = arith.maximumf %5, %6 : vector<8x64xf32>
    %c0_6 = arith.constant 0 : index
    %c0_7 = arith.constant 0 : index
    %8 = vector.load %arg4[%c0_6, %c0_7] : memref<64x64xf32, #tpu.memory_space<vmem>>, vector<64x64xf32>
    %cst_8 = arith.constant dense<0.000000e+00> : vector<8x64xf32>
    %9 = tpu.matmul %7, %8, %cst_8 {dimension_numbers = #tpu.dot_dimension_numbers<[1], [0], [0], [1], [0, 0, 1, 1], [], []>} : vector<8x64xf32>, vector<64x64xf32>, vector<8x64xf32> -> vector<8x64xf32>
    %c0_9 = arith.constant 0 : index
    %c0_10 = arith.constant 0 : index
    %10 = vector.load %arg5[%c0_9, %c0_10] : memref<1x64xf32, #tpu.memory_space<vmem>>, vector<1x64xf32>
    %11 = vector.broadcast %10 : vector<1x64xf32> to vector<8x64xf32>
    %12 = arith.addf %9, %11 : vector<8x64xf32>
    %cst_11 = arith.constant 0.000000e+00 : f32
    %13 = vector.broadcast %cst_11 : f32 to vector<8x64xf32>
    %14 = arith.maximumf %12, %13 : vector<8x64xf32>
    %c0_12 = arith.constant 0 : index
    %c0_13 = arith.constant 0 : index
    %15 = vector.load %arg6[%c0_12, %c0_13] : memref<64x128xf32, #tpu.memory_space<vmem>>, vector<64x128xf32>
    %cst_14 = arith.constant dense<0.000000e+00> : vector<8x128xf32>
    %16 = tpu.matmul %7, %15, %cst_14 {dimension_numbers = #tpu.dot_dimension_numbers<[1], [0], [0], [1], [0, 0, 1, 1], [], []>} : vector<8x64xf32>, vector<64x128xf32>, vector<8x128xf32> -> vector<8x128xf32>
    %c0_15 = arith.constant 0 : index
    %c0_16 = arith.constant 0 : index
    %17 = vector.load %arg7[%c0_15, %c0_16] : memref<64x128xf32, #tpu.memory_space<vmem>>, vector<64x128xf32>
    %cst_17 = arith.constant dense<0.000000e+00> : vector<8x128xf32>
    %18 = tpu.matmul %14, %17, %cst_17 {dimension_numbers = #tpu.dot_dimension_numbers<[1], [0], [0], [1], [0, 0, 1, 1], [], []>} : vector<8x64xf32>, vector<64x128xf32>, vector<8x128xf32> -> vector<8x128xf32>
    %19 = arith.addf %16, %18 : vector<8x128xf32>
    %c0_18 = arith.constant 0 : index
    %c0_19 = arith.constant 0 : index
    %20 = vector.load %arg8[%c0_18, %c0_19] : memref<1x128xf32, #tpu.memory_space<vmem>>, vector<1x128xf32>
    %21 = vector.broadcast %20 : vector<1x128xf32> to vector<8x128xf32>
    %22 = arith.addf %19, %21 : vector<8x128xf32>
    %c0_20 = arith.constant 0 : index
    %c0_21 = arith.constant 0 : index
    %23 = vector.load %arg9[%c0_20, %c0_21] : memref<8x128xf32, #tpu.memory_space<vmem>>, vector<8x128xf32>
    tpu.vector_store %arg9[%c0_20, %c0_21], %22 {strides = array<i32>} : memref<8x128xf32, #tpu.memory_space<vmem>>, vector<8x128xf32>,
    return
  }
  func.func @transform_0(%arg0: i32) -> (i32, i32) {
    %c0_i32 = arith.constant 0 : i32
    %c0_i32_0 = arith.constant 0 : i32
    return %arg0, %c0_i32 : i32, i32
  }
  func.func @transform_1(%arg0: i32) -> (i32, i32) {
    %c0_i32 = arith.constant 0 : i32
    %c0_i32_0 = arith.constant 0 : i32
    %c0_i32_1 = arith.constant 0 : i32
    return %c0_i32, %c0_i32_0 : i32, i32
  }
  func.func @transform_2(%arg0: i32) -> (i32, i32) {
    %c0_i32 = arith.constant 0 : i32
    %c0_i32_0 = arith.constant 0 : i32
    %c0_i32_1 = arith.constant 0 : i32
    return %c0_i32, %c0_i32_0 : i32, i32
  }
  func.func @transform_3(%arg0: i32) -> (i32, i32) {
    %c0_i32 = arith.constant 0 : i32
    %c0_i32_0 = arith.constant 0 : i32
    %c0_i32_1 = arith.constant 0 : i32
    return %c0_i32, %c0_i32_0 : i32, i32
  }
  func.func @transform_4(%arg0: i32) -> (i32, i32) {
    %c0_i32 = arith.constant 0 : i32
    %c0_i32_0 = arith.constant 0 : i32
    %c0_i32_1 = arith.constant 0 : i32
    return %c0_i32, %c0_i32_0 : i32, i32
  }
  func.func @transform_5(%arg0: i32) -> (i32, i32) {
    %c0_i32 = arith.constant 0 : i32
    %c0_i32_0 = arith.constant 0 : i32
    %c0_i32_1 = arith.constant 0 : i32
    return %c0_i32, %c0_i32_0 : i32, i32
  }
  func.func @transform_6(%arg0: i32) -> (i32, i32) {
    %c0_i32 = arith.constant 0 : i32
    %c0_i32_0 = arith.constant 0 : i32
    %c0_i32_1 = arith.constant 0 : i32
    return %c0_i32, %c0_i32_0 : i32, i32
  }
  func.func @transform_7(%arg0: i32) -> (i32, i32) {
    %c0_i32 = arith.constant 0 : i32
    %c0_i32_0 = arith.constant 0 : i32
    %c0_i32_1 = arith.constant 0 : i32
    return %c0_i32, %c0_i32_0 : i32, i32
  }
  func.func @transform_8(%arg0: i32) -> (i32, i32) {
    %c0_i32 = arith.constant 0 : i32
    %c0_i32_0 = arith.constant 0 : i32
    return %arg0, %c0_i32 : i32, i32
  }
}

</mosaic_0001>

<bundles_post_ra>
// kernel: bottom_model_forward.1
= control target key start
LH: loop header
LB: loop body
LE: loop exit
PB: predicated region body
PF: predicated region fallthrough
CT: control target
= control target key end

     0   :  { %vm37_vm0 = vcmask 195584   ;;  %vm74_vm1 = vcmask 523264   ;;  %s316_s1 = inlined_call_operand.vmem [shape: f32[24,64], index: 1, kind: input, shape index: {}]   ;;  %s317_s3 = inlined_call_operand.vmem [shape: f32[64,64], index: 3, kind: input, shape index: {}]   ;;  %s318_s5 = inlined_call_operand.vmem [shape: f32[64,128], index: 5, kind: input, shape index: {}]   ;;  %s319_s0 = inlined_call_operand.vmem [shape: f32[8,24], index: 0, kind: input, shape index: {}]   ;;  %s320_s2 = inlined_call_operand.vmem [shape: f32[1,64], index: 2, kind: input, shape index: {}]   ;;  %s321_s4 = inlined_call_operand.vmem [shape: f32[1,64], index: 4, kind: input, shape index: {}]   ;;  %s322_s6 = inlined_call_operand.vmem [shape: f32[64,128], index: 6, kind: input, shape index: {}]   ;;  %s323_s7 = inlined_call_operand.vmem [shape: f32[1,128], index: 7, kind: input, shape index: {}]   ;;  %s324_s8 = inlined_call_operand.vmem [shape: f32[8,128], index: 8, kind: output, shape index: {}]  }
   0x1   :  { %v32_v0 = vld [vmem:[%s316_s1 + $0x10] sm:$0xff]  ;;  %v31_v1 = vld [vmem:[%s316_s1 + $0x8] sm:$0xff]  ;;  %v69_v2 = vld [vmem:[%s317_s3 + $0x38] sm:$0xff] }
   0x2   :  { %54 = vmatpush.msra.mxu0 %v32_v0  ;;  %v106_v3 = vld [vmem:[%s318_s5 + $0x38] sm:$0xff]  ;;  %v30_v4 = vld [vmem:[%s316_s1] sm:$0xff]  ;;  %86 = vmatpush.msra.mxu1 %v69_v2  ;;  %v68_v5 = vld [vmem:[%s317_s3 + $0x30] sm:$0xff] }
   0x3   :  { %146 = vmatpush.msra.mxu3 %v106_v3  ;;  %v105_v6 = vld [vmem:[%s318_s5 + $0x30] sm:$0xff]  ;;  %v29_v7 = vld [vmem:[%s319_s0] sm:$0xff]  ;;  %v67_v8 = vld [vmem:[%s317_s3 + $0x28] sm:$0xff] }
   0x4   :  { %55 = vmatpush.msra.mxu0 %v31_v1  ;;  %87 = vmatpush.msra.mxu1 %v68_v5  ;;  %v104_v9 = vld [vmem:[%s318_s5 + $0x28] sm:$0xff]  ;;  %v66_v10 = vld [vmem:[%s317_s3 + $0x20] sm:$0xff]  ;;  %v65_v12 = vld [vmem:[%s317_s3 + $0x18] sm:$0xff] }
   0x5   :  { %147 = vmatpush.msra.mxu3 %v105_v6  ;;  %v103_v11 = vld [vmem:[%s318_s5 + $0x20] sm:$0xff]  ;;  %v102_v13 = vld [vmem:[%s318_s5 + $0x18] sm:$0xff]  ;;  %v64_v14 = vld [vmem:[%s317_s3 + $0x10] sm:$0xff] }
   0x6   :  { %56 = vmatpush.msra.mxu0 %v30_v4  ;;  %88 = vmatpush.msra.mxu1 %v67_v8  ;;  %v101_v15 = vld [vmem:[%s318_s5 + $0x10] sm:$0xff]  ;;  %v63_v16 = vld [vmem:[%s317_s3 + $0x8] sm:$0xff]  ;;  %v62_v18 = vld [vmem:[%s317_s3] sm:$0xff] }
   0x7   :  { %168 = vmatmul.msk.f32.vlgmr.msra.gmra.mxu0 %vm37_vm0, %v29_v7  ;;  %148 = vmatpush.msra.mxu3 %v104_v9  ;;  %v100_v17 = vld [vmem:[%s318_s5 + $0x8] sm:$0xff]  ;;  %v99_v19 = vld [vmem:[%s318_s5] sm:$0xff]  ;;  %v114_v20 = vld [vmem:[%s322_s6 + $0x38] sm:$0xff] }
   0x8   :  { %89 = vmatpush.msra.mxu1 %v66_v10  ;;  %v113_v21 = vld [vmem:[%s322_s6 + $0x30] sm:$0xff]  ;;  %126 = vmatpush.msra.mxu2 %v114_v20  ;;  %v112_v22 = vld [vmem:[%s322_s6 + $0x28] sm:$0xff]  ;;  %v111_v23 = vld [vmem:[%s322_s6 + $0x20] sm:$0xff] }
   0x9   :  { %149 = vmatpush.msra.mxu3 %v103_v11  ;;  %v110_v24 = vld [vmem:[%s322_s6 + $0x18] sm:$0xff]  ;;  %v172_v25 = vld [vmem:[%s320_s2] ss:$0 sm:$0xff]  ;;  %v109_v29 = vld [vmem:[%s322_s6 + $0x10] sm:$0xff] }
   0xa   :  { %90 = vmatpush.msra.mxu1 %v65_v12  ;;  %127 = vmatpush.msra.mxu2 %v113_v21  ;;  %v108_v30 = vld [vmem:[%s322_s6 + $0x8] sm:$0xff]  ;;  %v107_v31 = vld [vmem:[%s322_s6] sm:$0xff] }
   0xb   :  { %150 = vmatpush.msra.mxu3 %v102_v13  ;;  %v173_v32 = vld [vmem:[%s321_s4] ss:$0 sm:$0xff] }
   0xc   :  { %91 = vmatpush.msra.mxu1 %v64_v14  ;;  %128 = vmatpush.msra.mxu2 %v112_v22  ;;  %v174_v36 = vld [vmem:[%s323_s7] ss:$0 sm:$0xff] }
   0xd   :  { %151 = vmatpush.msra.mxu3 %v101_v15 }
   0xe   :  { %92 = vmatpush.msra.mxu1 %v63_v16  ;;  %129 = vmatpush.msra.mxu2 %v111_v23 }
   0xf   :  { %152 = vmatpush.msra.mxu3 %v100_v17 }
  0x10   :  { %93 = vmatpush.msra.mxu1 %v62_v18  ;;  %130 = vmatpush.msra.mxu2 %v110_v24 }
  0x11   :  { %153 = vmatpush.msra.mxu3 %v99_v19 }
  0x12   :  { %131 = vmatpush.msra.mxu2 %v109_v29 }
  0x14   :  { %132 = vmatpush.msra.mxu2 %v108_v30 }
  0x16   :  { %133 = vmatpush.msra.mxu2 %v107_v31 }
  0x84   :  { %v58_v26 = vpop.f32.mrf.mxu0 }
  0x85   :  { %v59_v27 = vadd.f32 %v172_v25, %v58_v26 }
  0x87   :  { %v61_v28 = vmax.f32 %v59_v27, 0.0 }
  0x89   :  { %169 = vmatmul.msk.f32.vlgmr.msra.gmra.mxu1 %vm74_vm1, %v61_v28  ;;  %171 = vmatmul.msk.f32.vlgmr.msra.gmra.mxu3 %vm74_vm1, %v61_v28 }
 0x106   :  { %v95_v33 = vpop.f32.mrf.mxu1 }
 0x107   :  { %v96_v34 = vadd.f32 %v173_v32, %v95_v33 }
 0x109   :  { %v98_v35 = vmax.f32 %v96_v34, 0.0 }
 0x10b   :  { %170 = vmatmul.msk.f32.vlgmr.msra.gmra.mxu2 %vm74_vm1, %v98_v35 }
 0x10c   :  { %v155_v37 = vpop.f32.mrf.mxu3 }
 0x18e   :  { %v135_v38 = vpop.f32.mrf.mxu2 }
 0x18f   :  { %v156_v39 = vadd.f32 %v155_v37, %v135_v38 }
 0x191   :  { %v162_v40 = vadd.f32 %v174_v36, %v156_v39 }
 0x193   :  { %163 = vst [vmem:[%s324_s8] sm:$0xff] %v162_v40 }

</bundles_post_ra>
